<compile_context>
chip_gen: v7x
topology: tpu7x:2x2x1
jax: 0.10.0
libtpu: 0.0.40
codegen_flags: <defaults>
</compile_context>

<pallas_src>
import functools

import jax
import jax.numpy as jnp
from jax.experimental import pallas as pl
from jax.experimental.pallas import tpu as pltpu


def calculate_laplacian_with_self_loop(adj):
    """D^-1/2 (A + I) D^-1/2 (assumes symmetric A, as in the TGCN helper)."""
    n = adj.shape[0]
    a = adj + jnp.eye(n, dtype=adj.dtype)
    row_sum = a.sum(axis=1)
    d_inv_sqrt = jnp.where(row_sum > 0, row_sum ** -0.5, 0.0)
    d_mat = jnp.diag(d_inv_sqrt)
    return (a @ d_mat).T @ d_mat


def xavier_uniform(key, shape, dtype=jnp.float32):
    fan_in, fan_out = shape
    limit = (6.0 / (fan_in + fan_out)) ** 0.5
    return jax.random.uniform(key, shape, dtype=dtype, minval=-limit, maxval=limit)


def _round_up(x, m):
    return ((x + m - 1) // m) * m


# --------------------------------------------------------------------------- #
# Stage 1: Z[n, b*O:(b+1)*O] = concat_b[n, :] @ W        (runs once per node tile)
# --------------------------------------------------------------------------- #
def _concat_matmul_kernel(cat_ref, w_ref, z_ref, *, batch_size):
    # cat_ref : (B, TZ, G+1)  f32   pre-concatenated [x, hidden] node tile
    # w_ref   : (G+1, O)      f32
    # z_ref   : (TZ, B*O)     compute dtype (lane-dense single store)
    zs = [
        jnp.dot(cat_ref[b], w_ref[...], preferred_element_type=jnp.float32)
        for b in range(batch_size)
    ]
    z_ref[...] = jnp.concatenate(zs, axis=-1).astype(z_ref.dtype)


# --------------------------------------------------------------------------- #
# Stage 2: out = lap @ Z + bias   (dominant, HBM-bound, batch packed on lanes)
# --------------------------------------------------------------------------- #
def _lap_matmul_kernel(lap_ref, z_ref, bias_ref, out_ref):
    # lap_ref : (TN, TK)   compute dtype (bf16 default -> half the HBM stream)
    # z_ref   : (TK, B*O)  compute dtype
    # bias_ref: (1, B*O)   f32
    # out_ref : (TN, B*O)  f32, block index constant over k -> VMEM resident,
    #           doubles as the reduction accumulator (no extra scratch).
    k = pl.program_id(1)
    contrib = jnp.dot(lap_ref[...], z_ref[...], preferred_element_type=jnp.float32)

    @pl.when(k == 0)
    def _():
        out_ref[...] = contrib + bias_ref[...]

    @pl.when(k > 0)
    def _():
        out_ref[...] += contrib


def tgcn_graph_convolution(inputs, hidden_state, laplacian, weights, biases,
                           num_gru_units, output_dim, *,
                           compute_dtype=jnp.bfloat16):
    """Pallas implementation of TGCNGraphConvolution.forward."""
    batch_size, num_nodes = inputs.shape
    G, O = num_gru_units, output_dim
    B, N = batch_size, num_nodes
    cdt = jnp.dtype(compute_dtype)
    VMEM_LIMIT = 32 * 1024 * 1024

    # ---------------- Tiling -------------------------------------------------
    # Node padding to 32 keeps row tiles 16-aligned (bf16 sublane packing) and
    # lets us always split rows into >= 2 "parallel" tiles for v7x megacore.
    if N <= 1024:
        n_pad = _round_up(max(N, 32), 32)
        tk = n_pad                       # single k tile (full lane extent OK)
        tn = n_pad // 2                  # >= 2 row tiles, multiple of 16
    else:
        n_pad = _round_up(N, 128)
        tk = 128
        for cand in (1024, 896, 768, 640, 512, 384, 256, 128):
            if n_pad % cand == 0:
                tk = cand
                break
        tn = 128
        for cand in (512, 384, 256, 128):
            if n_pad % cand == 0:
                tn = cand
                break
    num_i = n_pad // tn
    num_k = n_pad // tk

    # ---------------- Host-side data prep (layout plumbing only) ------------
    # Laplacian streamed in compute dtype (bf16 default halves dominant bytes).
    lap_p = jnp.zeros((n_pad, n_pad), cdt).at[:N, :N].set(laplacian.astype(cdt))
    # Pre-concatenated [x, hidden]: read exactly once by stage 1, kept f32.
    cat = jnp.concatenate(
        [inputs.reshape(B, N, 1), hidden_state.reshape(B, N, G)], axis=2)
    cat_p = jnp.zeros((B, n_pad, G + 1), jnp.float32).at[:, :N, :].set(
        cat.astype(jnp.float32))
    w = weights.astype(jnp.float32)                                  # (G+1, O)
    # Column layout of the packed output is b*O + o, so tile bias B times.
    bias_t = jnp.tile(biases.astype(jnp.float32).reshape(1, O), (1, B))

    # ---------------- Stage 1: Z = concat @ W  (tiny, runs once) ------------
    z = pl.pallas_call(
        functools.partial(_concat_matmul_kernel, batch_size=B),
        out_shape=jax.ShapeDtypeStruct((n_pad, B * O), cdt),
        grid_spec=pltpu.PrefetchScalarGridSpec(
            num_scalar_prefetch=0,
            grid=(num_i,),
            in_specs=[
                pl.BlockSpec((B, tn, G + 1), lambda i: (0, i, 0)),
                pl.BlockSpec((G + 1, O), lambda i: (0, 0)),
            ],
            out_specs=pl.BlockSpec((tn, B * O), lambda i: (i, 0)),
        ),
        compiler_params=pltpu.CompilerParams(
            dimension_semantics=("parallel",),
            vmem_limit_bytes=VMEM_LIMIT,
        ),
        cost_estimate=pl.CostEstimate(
            flops=2 * n_pad * B * (G + 1) * O,
            transcendentals=0,
            bytes_accessed=(B * n_pad * (G + 1) * 4 + (G + 1) * O * 4
                            + n_pad * B * O * cdt.itemsize)),
    )(cat_p, w)

    # ---------------- Stage 2: out = lap @ Z + bias  (dominant GEMM) --------
    y = pl.pallas_call(
        _lap_matmul_kernel,
        out_shape=jax.ShapeDtypeStruct((n_pad, B * O), jnp.float32),
        grid_spec=pltpu.PrefetchScalarGridSpec(
            num_scalar_prefetch=0,
            grid=(num_i, num_k),
            in_specs=[
                pl.BlockSpec((tn, tk), lambda i, k: (i, k)),       # laplacian
                pl.BlockSpec((tk, B * O), lambda i, k: (k, 0)),    # Z
                pl.BlockSpec((1, B * O), lambda i, k: (0, 0)),     # bias
            ],
            out_specs=pl.BlockSpec((tn, B * O), lambda i, k: (i, 0)),
        ),
        compiler_params=pltpu.CompilerParams(
            dimension_semantics=("parallel", "arbitrary"),
            vmem_limit_bytes=VMEM_LIMIT,
        ),
        cost_estimate=pl.CostEstimate(
            flops=2 * n_pad * n_pad * B * O,
            transcendentals=0,
            bytes_accessed=(n_pad * n_pad * cdt.itemsize            # laplacian
                            + num_i * n_pad * B * O * cdt.itemsize  # Z re-reads
                            + n_pad * B * O * 4                     # output
                            + B * O * 4)),                          # bias
    )(lap_p, z, bias_t)

    # Layout plumbing back to the PyTorch output layout (B, N*O).
    y = y[:N]                                                       # (N, B*O)
    return y.reshape(N, B, O).transpose(1, 0, 2).reshape(B, N * O)


def tgcn_graph_convolution_ref(inputs, hidden_state, laplacian, weights, biases,
                               num_gru_units, output_dim):
    """Pure-JAX reference mirroring the PyTorch forward step by step."""
    B, N = inputs.shape
    G, O = num_gru_units, output_dim
    x = inputs.reshape(B, N, 1)
    h = hidden_state.reshape(B, N, G)
    cat = jnp.concatenate([x, h], axis=2)                           # (B, N, G+1)
    cat = jnp.transpose(cat, (1, 2, 0)).reshape(N, (G + 1) * B)
    a_cat = laplacian @ cat
    a_cat = a_cat.reshape(N, G + 1, B)
    a_cat = jnp.transpose(a_cat, (2, 0, 1)).reshape(B * N, G + 1)
    out = a_cat @ weights + biases
    return out.reshape(B, N * O)


if __name__ == "__main__":
    def run_case(key, batch_size, num_nodes, num_gru_units, output_dim,
                 compute_dtype, tol, bias_init=0.0):
        k_adj, k_in, k_hid, k_w = jax.random.split(key, 4)
        adj_raw = jax.random.uniform(k_adj, (num_nodes, num_nodes),
                                     dtype=jnp.float32)
        adj = 0.5 * (adj_raw + adj_raw.T)
        laplacian = calculate_laplacian_with_self_loop(adj)
        weights = xavier_uniform(k_w, (num_gru_units + 1, output_dim))
        biases = jnp.full((output_dim,), bias_init, dtype=jnp.float32)
        inputs = jax.random.normal(k_in, (batch_size, num_nodes),
                                   dtype=jnp.float32)
        hidden = jax.random.normal(
            k_hid, (batch_size, num_nodes * num_gru_units), dtype=jnp.float32)

        out = tgcn_graph_convolution(inputs, hidden, laplacian, weights, biases,
                                     num_gru_units, output_dim,
                                     compute_dtype=compute_dtype)
        out = jax.block_until_ready(out)
        ref = tgcn_graph_convolution_ref(inputs, hidden, laplacian, weights,
                                         biases, num_gru_units, output_dim)
        assert out.shape == (batch_size, num_nodes * output_dim)
        err = float(jnp.max(jnp.abs(out - ref)))
        assert jnp.allclose(out, ref, atol=tol, rtol=tol), f"max abs err {err}"

    key = jax.random.PRNGKey(0)
    k1, k2, k3, k4, k5 = jax.random.split(key, 5)

    # Primary small case, default bf16 laplacian stream (f32 accumulation).
    run_case(k1, 2, 16, 32, 8, jnp.bfloat16, 1e-1)
    # Same case with full f32 (exact-path numerics).
    run_case(k2, 2, 16, 32, 8, jnp.float32, 1e-3)
    # Unaligned N, odd dims, nonzero bias -> exercises zero padding + bias.
    run_case(k3, 3, 37, 20, 4, jnp.float32, 1e-3, bias_init=0.5)
    # Mid-size N -> multiple row tiles (v7x megacore split), single k tile.
    run_case(k4, 2, 300, 16, 4, jnp.bfloat16, 1e-1)
    # N > 1024 -> multi-tile K-reduction over laplacian column tiles (f32).
    run_case(k5, 2, 1100, 16, 4, jnp.float32, 1e-3)

    print("KERNEL_OK")
</pallas_src>

<mosaic_0001>
module attributes {stable_mosaic.version = 11 : i64} {
  func.func @_concat_matmul_kernel(%arg0: i32, %arg1: memref<2x16x33xf32, #tpu.memory_space<vmem>>, %arg2: memref<33x8xf32, #tpu.memory_space<vmem>>, %arg3: memref<16x16xbf16, #tpu.memory_space<vmem>>) attributes {dimension_semantics = [#tpu.dimension_semantics<parallel>], iteration_bounds = array<i64: 2>, scalar_prefetch = 0 : i64, scratch_operands = 0 : i64, tpu.core_type = #tpu.core_type<tc>, window_params = [{transform_indices = @transform_0, window_bounds = array<i64: 2, 16, 33>}, {pipeline_mode = #tpu.pipeline_mode<synchronous>, transform_indices = @transform_1, window_bounds = array<i64: 33, 8>}, {transform_indices = @transform_2, window_bounds = array<i64: 16, 16>}]} {
    %c0 = arith.constant 0 : index
    %c0_0 = arith.constant 0 : index
    %c0_1 = arith.constant 0 : index
    %0 = vector.load %arg1[%c0, %c0_0, %c0_1] : memref<2x16x33xf32, #tpu.memory_space<vmem>>, vector<1x16x33xf32>
    %1 = vector.shape_cast %0 : vector<1x16x33xf32> to vector<16x33xf32>
    %c0_2 = arith.constant 0 : index
    %c0_3 = arith.constant 0 : index
    %2 = vector.load %arg2[%c0_2, %c0_3] : memref<33x8xf32, #tpu.memory_space<vmem>>, vector<33x8xf32>
    %cst = arith.constant dense<0.000000e+00> : vector<16x8xf32>
    %3 = tpu.matmul %1, %2, %cst {dimension_numbers = #tpu.dot_dimension_numbers<[1], [0], [0], [1], [0, 0, 1, 1], [], []>} : vector<16x33xf32>, vector<33x8xf32>, vector<16x8xf32> -> vector<16x8xf32>
    %c1 = arith.constant 1 : index
    %c0_4 = arith.constant 0 : index
    %c0_5 = arith.constant 0 : index
    %4 = vector.load %arg1[%c1, %c0_4, %c0_5] : memref<2x16x33xf32, #tpu.memory_space<vmem>>, vector<1x16x33xf32>
    %5 = vector.shape_cast %4 : vector<1x16x33xf32> to vector<16x33xf32>
    %c0_6 = arith.constant 0 : index
    %c0_7 = arith.constant 0 : index
    %6 = vector.load %arg2[%c0_6, %c0_7] : memref<33x8xf32, #tpu.memory_space<vmem>>, vector<33x8xf32>
    %cst_8 = arith.constant dense<0.000000e+00> : vector<16x8xf32>
    %7 = tpu.matmul %5, %6, %cst_8 {dimension_numbers = #tpu.dot_dimension_numbers<[1], [0], [0], [1], [0, 0, 1, 1], [], []>} : vector<16x33xf32>, vector<33x8xf32>, vector<16x8xf32> -> vector<16x8xf32>
    %8 = tpu.concatenate %3, %7 in 1 : vector<16x8xf32>, vector<16x8xf32> -> vector<16x16xf32>
    %9 = arith.truncf %8 : vector<16x16xf32> to vector<16x16xbf16>
    %c0_9 = arith.constant 0 : index
    %c0_10 = arith.constant 0 : index
    %10 = vector.load %arg3[%c0_9, %c0_10] : memref<16x16xbf16, #tpu.memory_space<vmem>>, vector<16x16xbf16>
    tpu.vector_store %arg3[%c0_9, %c0_10], %9 {strides = array<i32>} : memref<16x16xbf16, #tpu.memory_space<vmem>>, vector<16x16xbf16>,
    return
  }
  func.func @transform_0(%arg0: i32) -> (i32, i32, i32) {
    %c0_i32 = arith.constant 0 : i32
    %c0_i32_0 = arith.constant 0 : i32
    %c0_i32_1 = arith.constant 0 : i32
    return %c0_i32, %arg0, %c0_i32_0 : i32, i32, i32
  }
  func.func @transform_1(%arg0: i32) -> (i32, i32) {
    %c0_i32 = arith.constant 0 : i32
    %c0_i32_0 = arith.constant 0 : i32
    %c0_i32_1 = arith.constant 0 : i32
    return %c0_i32, %c0_i32_0 : i32, i32
  }
  func.func @transform_2(%arg0: i32) -> (i32, i32) {
    %c0_i32 = arith.constant 0 : i32
    %c0_i32_0 = arith.constant 0 : i32
    return %arg0, %c0_i32 : i32, i32
  }
}

</mosaic_0001>

<bundles_post_ra>
// kernel: tpu_custom_call.1
= control target key start
LH: loop header
LB: loop body
LE: loop exit
PB: predicated region body
PF: predicated region fallthrough
CT: control target
= control target key end

     0   :  { %7 = vsyncpa [#allocation3], 0  ;;  %s760_s0 = inlined_call_operand.hbm [shape: f32[2,32,33], index: 0, kind: input, shape index: {}]   ;;  %s761_s1 = inlined_call_operand.vmem [shape: f32[33,8], index: 1, kind: input, shape index: {}]   ;;  %s762_s2 = inlined_call_operand.vmem [shape: bf16[32,16], index: 2, kind: output, shape index: {}]  }
   0x1   :  { %9 = vsyncpa [#allocation3 + $0x1], 0  ;;  %s652_s9 = smov 0   ;;  %s654_s10 = smov 0  }
   0x2   :  { %s656_s11 = smov 0   ;;  %s658_s12 = smov 0  }
   0x3 LB: > { %s457_s13 = sadd.s32 4294967295, %s628_s12   ;;  %s672_s14 = sadd.s32 1, %s628_s12   ;;  %s628_s12 = sphi %s658_s12, %s768_s12   ;;  %s624_s11 = sphi %s656_s11, %s767_s11   ;;  %s620_s10 = sphi %s654_s10, %s766_s10   ;;  %s616_s9 = sphi %s652_s9, %s765_s9  }
   0x4   : > { %s19_s15 = ssub.s32 %s628_s12, %s672_s14  ;;  %s22_s16 = sadd.s32 1, %s624_s11 }
   0x5   : > { %p20_p0 = scmp.eq.s32.totalorder %s19_s15, 0  ;;  %p29_p1 = scmp.ne.s32.totalorder %s624_s11, %s620_s10 }
   0x6   : > { %p30_p2 = scmp.eq.s32.totalorder %s628_s12, 0  ;;  %p35_p3 = scmp.ne.s32.totalorder %s620_s10, %s616_s9 }
   0x7   : > { %s682_s17 = scalar_select %p20_p0, %s624_s11, %s22_s16  }
   0x8   : > { %p684_p4 = por %p30_p2, %p29_p1  ;;  %p36_p5 = scmp.eq.s32.totalorder %s457_s13, 0 }
   0x9   : > { %p460_p7 = scmp.ge.s32.totalorder %s628_s12, 2 }
   0xa   : > { %p690_p6 = por %p36_p5, %p35_p3 }
   0xb   : > { %105 = sbr.rel (%p460_p7) target bundleno = 31 (0x1f), region = 20 }
  0x12   : > { %s109_s20 = sand.u32 1, %s624_s11   ;;  %s482_s21 = sshll.u32 %s628_s12, 8 }
  0x13   : > { %s461_s22 = sshll.u32 %s109_s20, 5  ;;  %s119_s25 = scalar_lea.hbm %s760_s0, %s482_s21 }
  0x14   : > { %s541_s26 = scalar_select %p684_p4, [#allocation0], [#allocation6] }
  0x15   : > { %s113_s27 = scalar_lea.vmem [#allocation2], %s461_s22  ;;  %s630_s30 = smov 512  }
  0x16   : > { %s132_s28 = sshll.u32 %s113_s27, 4  ;;  %s124_s29 = sld [smem:[%s541_s26]]   ;;  %s133_s28 = int_to_ptr.vmem [resolvable:$true] %s132_s28 }
  0x17   : > { %542 = sst [smem:[#allocation5]] (%p684_p4), %s630_s30  ;;  %s631_s3 = smov 256  }
  0x18   : > { %543 = sst [smem:[#allocation5 + $0x1]] (%p684_p4), %s631_s3  ;;  %s632_s4 = smov 2  }
  0x19   : > { %544 = sst [smem:[#allocation5 + $0x2]] (%p684_p4), %s632_s4  ;;  %s633_s5 = smov 128  }
  0x1a   : > { %545 = sst [smem:[#allocation5 + $0x3]] (%p684_p4), %s633_s5  ;;  %s634_s7 = smov 8  }
  0x1b   : > { %546 = sst [smem:[#allocation5 + $0x4]] (%p684_p4), %s633_s5  ;;  %s110_s9 = scalar_lea.sflag [#allocation3], %s109_s20 }
  0x1c   : > { %s464_s6 = sshll.u32 %s124_s29, 26  ;;  %547 = sst [smem:[#allocation5 + $0x5]] (%p684_p4), %s634_s7 }
  0x1d   : > { %s465_s8 = sadd.s32 134217728, %s464_s6  ;;  %s635_s15 = smov [#allocation4]  }
  0x1e   : > { %548 = dma.general (%p684_p4), %s119_s25, 512, %s133_s28, %s110_s9, %s635_s15, [#allocation5], %s465_s8, 0  }
  0x1f PF: > { %p466_p8 = scmp.ge.s32.totalorder %s628_s12, 1  ;;  %p153_p9 = scmp.lt.s32.totalorder %s628_s12, 3 }
  0x21   : > { %p154_p10 = pnand %p466_p8, %p153_p9 }
  0x22   : > { %s159_s16 = sand.u32 (!%p154_p10), 1, %s620_s10  }
  0x23   : > { %157 = sbr.rel (%p154_p10) target bundleno = 392 (0x188), region = 28  ;;  %s467_s21 = sshll.u32 (!%p154_p10), %s159_s16, 5 }
  0x24   : > { %s160_s22 = scalar_lea.sflag (!%p154_p10), [#allocation3], %s159_s16  ;;  %s163_s23 = scalar_lea.vmem (!%p154_p10), [#allocation2], %s467_s21 }
  0x2a   : > { %611 = dma.done.wait (%p690_p6), %s160_s22, 512  }
  0x2b   : > { %613 = vsyncadd (%p690_p6), %s160_s22, 4294966784  ;;  %vm198_vm0 = vcmask 269312   ;;  %v193_v0 = vld [vmem:[%s761_s1] sm:$0xff]  ;;  %v194_v1 = vld [vmem:[%s761_s1 + $0x8] sm:$0xff]  ;;  %vm205_vm1 = vcmask 1040384   ;;  %s636_s3 = smov 8  }
  0x2c   : > { %v195_v2 = vld [vmem:[%s761_s1 + $0x10] sm:$0xff]  ;;  %v525_v3 = vpack.c.bf16 %v194_v1, %v193_v0  ;;  %v196_v4 = vld [vmem:[%s761_s1 + $0x18] sm:$0xff]  ;;  %v191_v7 = vld [vmem:[%s163_s23] sm:$0xff]  ;;  %s468_s4 = sshll.u32 %s457_s13, 1  ;;  %vm376_vm2 = vcmask 64512   ;;  %vm387_vm3 = vcmask 125952  }
  0x2d   : > { %v473_v5 = vld [vmem:[%s163_s23 + $0x10] sm:$0xff]  ;;  %v529_v6 = vpack.c.bf16 %v196_v4, %v195_v2  ;;  %v197_v8 = vld [vmem:[%s761_s1 + $0x20] sm:$0x1]  ;;  %509 = vmatprep.mubr.msk.f32.mxu0 %vm198_vm0, %v191_v7  ;;  %v474_v9 = vld [vmem:[%s163_s23 + $0x18] sm:$0xff]  ;;  %p186_p11 = scmp.lt.s32.totalorder %s468_s4, 3 }
  0x2e   : > { %522 = vmatprep.mubr.msk.f32.mxu1 %vm198_vm0, %v473_v5  ;;  %534 = vmatprep.subr.bf16.mxu1 %v525_v3  ;;  %v192_v10 = vld [vmem:[%s163_s23 + $0x8] sm:$0xff] }
  0x2f   : > { %526 = vmatprep.subr.bf16.mxu0 %v525_v3  ;;  %536 = vmatpush3.bf16.msra.mxu1 %v525_v3  ;;  %s770_s4 = smov (!%p186_p11, %s468_s4), 3 }
  0x30   : > { %528 = vmatpush3.bf16.msra.mxu0 %v525_v3  ;;  %538 = vmatprep.subr.bf16.mxu1 %v529_v6  ;;  %s469_s5 = sshll.u32 %s770_s4, 2 }
  0x31   : > { %530 = vmatprep.subr.bf16.mxu0 %v529_v6  ;;  %s189_s8 = scalar_lea.vmem %s762_s2, %s469_s5 }
  0x33   : > { %540 = vmatpush3.bf16.msra.mxu1 %v529_v6 }
  0x34   : > { %532 = vmatpush3.bf16.msra.mxu0 %v529_v6  ;;  %520 = vmatprep.subr.msk.mxu1 %vm205_vm1, %v197_v8 }
  0x35   : > { %507 = vmatprep.subr.msk.mxu0 %vm205_vm1, %v197_v8 }
  0x37   : > { %521 = vmatpush3.msk.msra.mxu1 %vm205_vm1, %v197_v8 }
  0x38   : > { %508 = vmatpush3.msk.msra.mxu0 %vm205_vm1, %v197_v8  ;;  %523 = vmatmul.mubr.msk.f32.vlgmr.msra.gmra.mrb[0].mxu1 %vm198_vm0, %v474_v9 }
  0x39   : > { %510 = vmatmul.mubr.msk.f32.vlgmr.msra.gmra.mrb[0].mxu0 %vm198_vm0, %v192_v10 }
 0x10b   : > { %v524_v11 = vpop.f32.mrb[0].mxu1 }
 0x10c   : > { %v511_v12 = vpop.f32.mrb[0].mxu0  ;;  %v359_v13 = vpop.f32.mrb[1].mxu1 }
 0x10d   : > { %v275_v14 = vpop.f32.mrb[1].mxu0  ;;  %v589_v15 = vpack.i.bf16 %v524_v11, %v359_v13 }
 0x10f   : > { %590 = vrot.lane.b32.xlu0 %v589_v15, %s636_s3 }
 0x181   : > { %v591_v16 = vpop.permute.xlu0 %590 }
 0x182   : > { %v593_v17 = vunpack.i.h.bf16 %v591_v16  ;;  %v592_v18 = vunpack.i.l.bf16 %v591_v16 }
 0x184   : > { %v378_v19 = vsel %vm376_vm2, %v511_v12, %v593_v17  ;;  %v377_v20 = vsel %vm376_vm2, %v275_v14, %v592_v18 }
 0x185   : > { %v484_v21 = vpack.c.bf16 %v378_v19, %v378_v19  ;;  %v483_v22 = vpack.c.bf16 %v377_v20, %v377_v20 }
 0x187   : > { %388 = vst.msk [vmem:[%s189_s8] sm:$0xf] %vm387_vm3, %v483_v22  ;;  %389 = vst.msk [vmem:[%s189_s8 + $0x4] sm:$0xf] %vm387_vm3, %v484_v21 }
 0x188 PF: > { %p12_p12 = scmp.ge.s32.totalorder %s672_s14, 4   ;;  %s765_s9 = smov %s620_s10 }
 0x189   : > { %s766_s10 = smov %s624_s11  ;;  %s767_s11 = smov %s682_s17 }
 0x18a   : > { %s768_s12 = smov %s672_s14  ;;  %14 = sbr.rel (!%p12_p12) target bundleno = 3 (0x3), region = 74 }
 0x191   :  { %412 = vsyncpa [#allocation3], 1 }
 0x192   :  { %414 = vsyncpa [#allocation3 + $0x1], 1 }

</bundles_post_ra>
